<compile_context>
chip_gen: v7x
topology: tpu7x:2x2x1
jax: 0.10.0
libtpu: 0.0.40
codegen_flags: <defaults>
</compile_context>

<pallas_src>
import math

import jax
import jax.numpy as jnp
from jax.experimental import pallas as pl
from jax.experimental.pallas import tpu as pltpu


# ----------------------------------------------------------------------------
# Spectral mesh helpers (mirrors torch-cfd fno/sfno.py buffers).
# ----------------------------------------------------------------------------
def fft_mesh_2d(n, diam):
    k = jnp.fft.fftfreq(n, d=diam / n).astype(jnp.float32)
    kx, ky = jnp.meshgrid(k, k, indexing="ij")
    return kx, ky


def spectral_laplacian_2d(fft_mesh):
    kx, ky = fft_mesh
    lap = -4.0 * (math.pi ** 2) * (jnp.abs(kx) ** 2 + jnp.abs(ky) ** 2)
    lap = lap.at[0, 0].set(1.0)  # avoid division by zero at the zero mode
    return lap.astype(jnp.float32)


def helmholtz_coefficients(kx, ky, lap):
    """Fold kx/ky/lap into the three real projection coefficient planes."""
    four_pi2 = jnp.float32(4.0 * math.pi ** 2)
    pxx = (four_pi2 * kx * kx / lap).astype(jnp.float32)
    pxy = (four_pi2 * kx * ky / lap).astype(jnp.float32)
    pyy = (four_pi2 * ky * ky / lap).astype(jnp.float32)
    return pxx, pxy, pyy


# ----------------------------------------------------------------------------
# Pallas kernel: one (2, TX, L) slab of one batch element.
# ----------------------------------------------------------------------------
def _helmholtz_kernel(pxx_ref, pxy_ref, pyy_ref, u_ref, w_ref):
    pxx = pxx_ref[...]            # (TX, L)
    pxy = pxy_ref[...]
    pyy = pyy_ref[...]

    ux = u_ref[0, 0]              # (TX, L) — re/im interleaved on lanes
    uy = u_ref[0, 1]

    # Purely real elementwise projection; identical for re and im lanes.
    w_ref[0, 0] = ux + pxx * ux + pxy * uy
    w_ref[0, 1] = uy + pxy * ux + pyy * uy


# ----------------------------------------------------------------------------
# Wrapper: layout plumbing + pallas_call.
# ----------------------------------------------------------------------------
def _pick_row_tile(nx, lane_width, target_bytes=1 << 20):
    """Largest row tile (multiple of 8, dividing nx) with a (2, tx, L) f32
    block under target_bytes; falls back to the full nx (always legal)."""
    max_tx = max(8, target_bytes // (2 * lane_width * 4))
    if nx <= max_tx:
        return nx
    tx = min((max_tx // 8) * 8, nx)
    while tx >= 8:
        if nx % tx == 0:
            return tx
        tx -= 8
    return nx


def _expand_coeff(p, nt2):
    nx, ny = p.shape
    return jnp.broadcast_to(p[:, :, None], (nx, ny, nt2)).reshape(nx, ny * nt2)


def helmholtz_projection(uhat, pxx, pxy, pyy):
    """uhat: (b, 2, nx, ny, nt) complex64 -> (b, 2, nx, ny, nt) complex64."""
    b, ncomp, nx, ny, nt = uhat.shape
    assert ncomp == 2
    nt2 = nt * 2
    L = ny * nt2  # lane axis: (ny, nt, re/im) flattened, full-dim & >= 128

    # One fused pass complex64 -> interleaved (re, im) float32 pairs; the
    # subsequent reshape is a contiguous collapse (no transpose, no copy).
    u_ri = jnp.stack(
        [jnp.real(uhat).astype(jnp.float32), jnp.imag(uhat).astype(jnp.float32)],
        axis=-1)
    u_flat = u_ri.reshape(b, 2, nx, L)

    # Coefficient planes broadcast once to the flattened lane layout (tiny).
    pxx_b = _expand_coeff(pxx, nt2)
    pxy_b = _expand_coeff(pxy, nt2)
    pyy_b = _expand_coeff(pyy, nt2)

    tx = _pick_row_tile(nx, L)
    grid = (nx // tx, b)

    u_spec = pl.BlockSpec((1, 2, tx, L), lambda i, j: (j, 0, i, 0))
    p_spec = pl.BlockSpec((tx, L), lambda i, j: (i, 0))

    n_elems = b * 2 * nx * L
    cost = pl.CostEstimate(
        flops=4 * n_elems,
        transcendentals=0,
        bytes_accessed=(2 * n_elems + 3 * nx * L) * 4,
    )

    w_flat = pl.pallas_call(
        _helmholtz_kernel,
        out_shape=jax.ShapeDtypeStruct((b, 2, nx, L), jnp.float32),
        grid_spec=pltpu.PrefetchScalarGridSpec(
            num_scalar_prefetch=0,
            grid=grid,
            in_specs=[p_spec, p_spec, p_spec, u_spec],
            out_specs=u_spec,
        ),
        compiler_params=pltpu.CompilerParams(
            dimension_semantics=("parallel", "parallel")),
        cost_estimate=cost,
    )(pxx_b, pxy_b, pyy_b, u_flat)

    # Contiguous split back to (b, 2, nx, ny, nt, 2) then recombine to complex.
    w_ri = w_flat.reshape(b, 2, nx, ny, nt, 2)
    return jax.lax.complex(w_ri[..., 0], w_ri[..., 1])


# ----------------------------------------------------------------------------
# Pure-JAX reference (mirrors the PyTorch forward).
# ----------------------------------------------------------------------------
def helmholtz_reference(uhat, kx, ky, lap):
    kx_ = kx[None, :, :, None]
    ky_ = ky[None, :, :, None]
    lap_ = lap[None, None, :, :, None]
    div_u = 2j * math.pi * (kx_ * uhat[:, 0] + ky_ * uhat[:, 1])
    grad_div_u = jnp.stack(
        [2j * math.pi * kx_ * div_u, 2j * math.pi * ky_ * div_u], axis=1)
    return uhat - grad_div_u / lap_


if __name__ == "__main__":
    # Small shapes: batch=2, 2 vector components, 16x16 spatial grid,
    # nt = 8//2 + 1 = 5 retained time frequencies.
    b, nx, ny, nt = 2, 16, 16, 5
    n_grid, diam = nx, 2.0 * math.pi

    kx, ky = fft_mesh_2d(n_grid, diam)
    lap = spectral_laplacian_2d((kx, ky))
    pxx, pxy, pyy = helmholtz_coefficients(kx, ky, lap)

    key = jax.random.PRNGKey(0)
    kre, kim = jax.random.split(key)
    u_re = jax.random.normal(kre, (b, 2, nx, ny, nt), dtype=jnp.float32)
    u_im = jax.random.normal(kim, (b, 2, nx, ny, nt), dtype=jnp.float32)
    uhat = u_re + 1j * u_im  # complex64

    w_hat = helmholtz_projection(uhat, pxx, pxy, pyy)
    w_hat = jax.block_until_ready(w_hat)

    w_ref = helmholtz_reference(uhat, kx, ky, lap)
    assert w_hat.shape == uhat.shape and w_hat.dtype == jnp.complex64
    assert jnp.allclose(w_hat, w_ref, rtol=1e-4, atol=1e-4)

    print("KERNEL_OK")
</pallas_src>

<mosaic_0001>
module attributes {stable_mosaic.version = 11 : i64} {
  func.func @_helmholtz_kernel(%arg0: i32, %arg1: i32, %arg2: memref<16x160xf32, #tpu.memory_space<vmem>>, %arg3: memref<16x160xf32, #tpu.memory_space<vmem>>, %arg4: memref<16x160xf32, #tpu.memory_space<vmem>>, %arg5: memref<1x2x16x160xf32, #tpu.memory_space<vmem>>, %arg6: memref<1x2x16x160xf32, #tpu.memory_space<vmem>>) attributes {dimension_semantics = [#tpu.dimension_semantics<parallel>, #tpu.dimension_semantics<parallel>], iteration_bounds = array<i64: 1, 2>, scalar_prefetch = 0 : i64, scratch_operands = 0 : i64, tpu.core_type = #tpu.core_type<tc>, window_params = [{transform_indices = @transform_0, window_bounds = array<i64: 16, 160>}, {transform_indices = @transform_1, window_bounds = array<i64: 16, 160>}, {transform_indices = @transform_2, window_bounds = array<i64: 16, 160>}, {transform_indices = @transform_3, window_bounds = array<i64: 1, 2, 16, 160>}, {transform_indices = @transform_4, window_bounds = array<i64: 1, 2, 16, 160>}]} {
    %c0 = arith.constant 0 : index
    %c0_0 = arith.constant 0 : index
    %0 = vector.load %arg2[%c0, %c0_0] : memref<16x160xf32, #tpu.memory_space<vmem>>, vector<16x160xf32>
    %c0_1 = arith.constant 0 : index
    %c0_2 = arith.constant 0 : index
    %1 = vector.load %arg3[%c0_1, %c0_2] : memref<16x160xf32, #tpu.memory_space<vmem>>, vector<16x160xf32>
    %c0_3 = arith.constant 0 : index
    %c0_4 = arith.constant 0 : index
    %2 = vector.load %arg4[%c0_3, %c0_4] : memref<16x160xf32, #tpu.memory_space<vmem>>, vector<16x160xf32>
    %c0_5 = arith.constant 0 : index
    %c0_6 = arith.constant 0 : index
    %c0_7 = arith.constant 0 : index
    %c0_8 = arith.constant 0 : index
    %3 = vector.load %arg5[%c0_5, %c0_6, %c0_7, %c0_8] : memref<1x2x16x160xf32, #tpu.memory_space<vmem>>, vector<1x1x16x160xf32>
    %4 = vector.shape_cast %3 : vector<1x1x16x160xf32> to vector<16x160xf32>
    %c0_9 = arith.constant 0 : index
    %c1 = arith.constant 1 : index
    %c0_10 = arith.constant 0 : index
    %c0_11 = arith.constant 0 : index
    %5 = vector.load %arg5[%c0_9, %c1, %c0_10, %c0_11] : memref<1x2x16x160xf32, #tpu.memory_space<vmem>>, vector<1x1x16x160xf32>
    %6 = vector.shape_cast %5 : vector<1x1x16x160xf32> to vector<16x160xf32>
    %7 = arith.mulf %0, %4 : vector<16x160xf32>
    %8 = arith.addf %4, %7 : vector<16x160xf32>
    %9 = arith.mulf %1, %6 : vector<16x160xf32>
    %10 = arith.addf %8, %9 : vector<16x160xf32>
    %c0_12 = arith.constant 0 : index
    %c0_13 = arith.constant 0 : index
    %c0_14 = arith.constant 0 : index
    %c0_15 = arith.constant 0 : index
    %11 = vector.load %arg6[%c0_12, %c0_13, %c0_14, %c0_15] : memref<1x2x16x160xf32, #tpu.memory_space<vmem>>, vector<1x1x16x160xf32>
    %12 = vector.shape_cast %11 : vector<1x1x16x160xf32> to vector<16x160xf32>
    %13 = vector.shape_cast %10 : vector<16x160xf32> to vector<1x1x16x160xf32>
    tpu.vector_store %arg6[%c0_12, %c0_13, %c0_14, %c0_15], %13 {strides = array<i32>} : memref<1x2x16x160xf32, #tpu.memory_space<vmem>>, vector<1x1x16x160xf32>,
    %14 = arith.mulf %1, %4 : vector<16x160xf32>
    %15 = arith.addf %6, %14 : vector<16x160xf32>
    %16 = arith.mulf %2, %6 : vector<16x160xf32>
    %17 = arith.addf %15, %16 : vector<16x160xf32>
    %c0_16 = arith.constant 0 : index
    %c1_17 = arith.constant 1 : index
    %c0_18 = arith.constant 0 : index
    %c0_19 = arith.constant 0 : index
    %18 = vector.load %arg6[%c0_16, %c1_17, %c0_18, %c0_19] : memref<1x2x16x160xf32, #tpu.memory_space<vmem>>, vector<1x1x16x160xf32>
    %19 = vector.shape_cast %18 : vector<1x1x16x160xf32> to vector<16x160xf32>
    %20 = vector.shape_cast %17 : vector<16x160xf32> to vector<1x1x16x160xf32>
    tpu.vector_store %arg6[%c0_16, %c1_17, %c0_18, %c0_19], %20 {strides = array<i32>} : memref<1x2x16x160xf32, #tpu.memory_space<vmem>>, vector<1x1x16x160xf32>,
    return
  }
  func.func @transform_0(%arg0: i32, %arg1: i32) -> (i32, i32) {
    %c0_i32 = arith.constant 0 : i32
    %c0_i32_0 = arith.constant 0 : i32
    return %arg0, %c0_i32 : i32, i32
  }
  func.func @transform_1(%arg0: i32, %arg1: i32) -> (i32, i32) {
    %c0_i32 = arith.constant 0 : i32
    %c0_i32_0 = arith.constant 0 : i32
    return %arg0, %c0_i32 : i32, i32
  }
  func.func @transform_2(%arg0: i32, %arg1: i32) -> (i32, i32) {
    %c0_i32 = arith.constant 0 : i32
    %c0_i32_0 = arith.constant 0 : i32
    return %arg0, %c0_i32 : i32, i32
  }
  func.func @transform_3(%arg0: i32, %arg1: i32) -> (i32, i32, i32, i32) {
    %c0_i32 = arith.constant 0 : i32
    %c0_i32_0 = arith.constant 0 : i32
    %c0_i32_1 = arith.constant 0 : i32
    return %arg1, %c0_i32, %arg0, %c0_i32_0 : i32, i32, i32, i32
  }
  func.func @transform_4(%arg0: i32, %arg1: i32) -> (i32, i32, i32, i32) {
    %c0_i32 = arith.constant 0 : i32
    %c0_i32_0 = arith.constant 0 : i32
    %c0_i32_1 = arith.constant 0 : i32
    return %arg1, %c0_i32, %arg0, %c0_i32_0 : i32, i32, i32, i32
  }
}

</mosaic_0001>

<bundles_post_ra>
// kernel: tpu_custom_call.1
= control target key start
LH: loop header
LB: loop body
LE: loop exit
PB: predicated region body
PF: predicated region fallthrough
CT: control target
= control target key end

     0   :  { %9 = vsyncpa [#allocation3], 0  ;;  %s1176_s0 = inlined_call_operand.hbm [shape: f32[16,160], index: 0, kind: input, shape index: {}]   ;;  %s1177_s1 = inlined_call_operand.hbm [shape: f32[16,160], index: 1, kind: input, shape index: {}]   ;;  %s1178_s2 = inlined_call_operand.hbm [shape: f32[16,160], index: 2, kind: input, shape index: {}]   ;;  %s1179_s3 = inlined_call_operand.hbm [shape: f32[2,2,16,160], index: 3, kind: input, shape index: {}]   ;;  %s1180_s4 = inlined_call_operand.hbm [shape: f32[2,2,16,160], index: 4, kind: output, shape index: {}]  }
   0x1   :  { %10 = vsyncpa [#allocation6], 0 }
   0x2   :  { %11 = vsyncpa [#allocation9], 0 }
   0x3   :  { %13 = vsyncpa [#allocation9 + $0x1], 0 }
   0x4   :  { %14 = vsyncpa [#allocation4], 0 }
   0x5   :  { %16 = vsyncpa [#allocation4 + $0x1], 0  ;;  %s883_s15 = smov 0   ;;  %s885_s16 = smov 0  }
   0x6   :  { %s887_s17 = smov 0   ;;  %s889_s18 = smov 0  }
   0x7   :  { %s891_s19 = smov 0   ;;  %s893_s20 = smov 0  }
   0x8 LB: > { %1187 = sst [smem:[#allocation15_spill]] %s827_s15  ;;  %s515_s21 = sadd.s32 4294967295, %s847_s20   ;;  %s847_s20 = sphi %s893_s20, %s22_s20   ;;  %s843_s19 = sphi %s891_s19, %s1210_s19   ;;  %s839_s18 = sphi %s889_s18, %s1209_s18   ;;  %s835_s17 = sphi %s887_s17, %s1208_s17   ;;  %s831_s16 = sphi %s885_s16, %s1207_s16   ;;  %s827_s15 = sphi %s883_s15, %s1206_s15  }
   0x9   : > { %s516_s22 = sadd.s32 4294967294, %s847_s20   ;;  %p134_p0 = scmp.ne.s32.totalorder %s831_s16, %s827_s15 }
   0xa   : > { %p917_p1 = scmp.eq.s32.totalorder %s515_s21, 0  ;;  %p921_p2 = scmp.eq.s32.totalorder %s515_s21, 1 }
   0xb   : > { %p166_p3 = scmp.eq.s32.totalorder %s516_s22, 1  ;;  %p517_p5 = scmp.ge.s32.totalorder %s847_s20, 1 }
   0xc   : > { %s1188_s23 = scalar_select %p917_p1, 1, 0 }
   0xd   : > { %s1189_s24 = scalar_select %p921_p2, 1, 0 }
   0xe   : > { %p927_p4 = por %p917_p1, %p134_p0  ;;  %p932_p6 = por %p166_p3, %p134_p0 }
   0xf   : > { %p173_p7 = scmp.lt.s32.totalorder %s847_s20, 3  ;;  %s849_s28 = smov [#allocation5]  }
  0x10   : > { %s1190_s25 = scalar_select %p927_p4, 1, 0 }
  0x11   : > { %s1191_s26 = scalar_select %p932_p6, 1, 0 }
  0x12   : > { %p937_p8 = pnand %p517_p5, %p173_p7  ;;  %s206_s29 = sshll.u32 %s849_s28, 4  ;;  %s207_s29 = int_to_ptr.vmem [resolvable:$true] %s206_s29 }
  0x13   : > { %1192 = sst [smem:[#allocation16_spill]] %s1191_s26  ;;  %s850_s5 = smov [#allocation2]  }
  0x14   : > { %s1193_s27 = scalar_select %p937_p8, 1, 0 }
  0x15   : > { %p562_p10 = pneg %p937_p8  ;;  %s189_s6 = sshll.u32 %s850_s5, 4  ;;  %s190_s6 = int_to_ptr.vmem [resolvable:$true] %s189_s6 }
  0x16   : > { %s643_s9 = scalar_lea.hbm %s1177_s1, 512 }
  0x17   : > { %p946_p11 = pnand %p562_p10, %p917_p1  ;;  %p644_p12 = scmp.ne.s32.totalorder %s1177_s1, %s643_s9 }
  0x18   : > { %p650_p5 = scmp.lt.u32.totalorder %s643_s9, %s1177_s1 }
  0x19   : > { %p958_p13 = pneg %p946_p11 }
  0x1b   : > { %p646_p0 = pnand %p958_p13, %p644_p12 }
  0x1d   : > { %p647_p3 = pneg %p646_p0 }
  0x1f   : > { %p652_p7 = pnand %p650_p5, %p647_p3 }
  0x21   : > { %655 = shalt.err (!%p652_p7)
}
  0x22   : > { %s656_s21 = scalar_lea.vmem %s207_s29, 512  ;;  %p664_p4 = scmp.lt.s32.totalorder %s207_s29, %s207_s29 }
  0x23   : > { %p657_p10 = scmp.ne.s32.totalorder %s207_s29, %s656_s21  ;;  %p665_p1 = scmp.lt.s32.totalorder %s656_s21, %s656_s21 }
  0x25   : > { %p659_p9 = pnand %p657_p10, %p958_p13  ;;  %p666_p8 = por %p665_p1, %p664_p4 }
  0x27   : > { %p660_p6 = pneg %p659_p9 }
  0x29   : > { %p667_p2 = pnand %p666_p8, %p660_p6 }
  0x2b   : > { %670 = shalt.err (!%p667_p2)
}
  0x2c   : > { %s851_s22 = smov 256   ;;  %s852_s28 = smov 16  }
  0x2d   : > { %568 = dma.hbm_to_vmem [thread:$0]  (!%p946_p11), %s1177_s1, 512, %s207_s29, [#allocation6], %s851_s22, %s851_s22, %s852_s28  }
  0x2e   : > { %s853_s8 = smov [#allocation7]   ;;  %s671_s13 = scalar_lea.hbm %s1176_s0, 512 }
  0x2f   : > { %s223_s9 = sshll.u32 %s853_s8, 4  ;;  %p672_p1 = scmp.ne.s32.totalorder %s1176_s0, %s671_s13  ;;  %s224_s9 = int_to_ptr.vmem [resolvable:$true] %s223_s9 }
  0x30   : > { %p678_p6 = scmp.lt.u32.totalorder %s671_s13, %s1176_s0 }
  0x31   : > { %p674_p2 = pnand %p672_p1, %p958_p13 }
  0x33   : > { %p675_p4 = pneg %p674_p2 }
  0x35   : > { %p680_p8 = pnand %p678_p6, %p675_p4 }
  0x37   : > { %683 = shalt.err (!%p680_p8)
}
  0x38   : > { %s684_s29 = scalar_lea.vmem %s190_s6, 512  ;;  %p692_p3 = scmp.lt.s32.totalorder %s190_s6, %s190_s6 }
  0x39   : > { %p685_p9 = scmp.ne.s32.totalorder %s190_s6, %s684_s29  ;;  %p693_p5 = scmp.lt.s32.totalorder %s684_s29, %s684_s29 }
  0x3b   : > { %p687_p12 = pnand %p685_p9, %p958_p13  ;;  %p694_p7 = por %p693_p5, %p692_p3 }
  0x3d   : > { %p688_p0 = pneg %p687_p12 }
  0x3f   : > { %p695_p10 = pnand %p694_p7, %p688_p0 }
  0x41   : > { %698 = shalt.err (!%p695_p10)
}
  0x42   : > { %565 = dma.hbm_to_vmem [thread:$0]  (!%p946_p11), %s1176_s0, 512, %s190_s6, [#allocation3], %s851_s22, %s851_s22, %s852_s28  }
  0x43   : > { %s699_s8 = scalar_lea.hbm %s1178_s2, 512 }
  0x44   : > { %p700_p1 = scmp.ne.s32.totalorder %s1178_s2, %s699_s8  ;;  %p706_p6 = scmp.lt.u32.totalorder %s699_s8, %s1178_s2 }
  0x46   : > { %p702_p2 = pnand %p700_p1, %p958_p13 }
  0x48   : > { %p703_p4 = pneg %p702_p2 }
  0x4a   : > { %p708_p8 = pnand %p706_p6, %p703_p4 }
  0x4c   : > { %711 = shalt.err (!%p708_p8)
}
  0x4d   : > { %s712_s21 = scalar_lea.vmem %s224_s9, 512  ;;  %p720_p3 = scmp.lt.s32.totalorder %s224_s9, %s224_s9 }
  0x4e   : > { %p713_p9 = scmp.ne.s32.totalorder %s224_s9, %s712_s21  ;;  %p721_p5 = scmp.lt.s32.totalorder %s712_s21, %s712_s21 }
  0x50   : > { %p715_p12 = pnand %p713_p9, %p958_p13  ;;  %p722_p7 = por %p721_p5, %p720_p3 }
  0x52   : > { %p716_p0 = pneg %p715_p12 }
  0x54   : > { %p723_p10 = pnand %p722_p7, %p716_p0 }
  0x56   : > { %726 = shalt.err (!%p723_p10)
}
  0x57   : > { %571 = dma.hbm_to_vmem [thread:$0]  (!%p946_p11), %s1178_s2, 512, %s224_s9, [#allocation6], %s851_s22, %s851_s22, %s852_s28  }
  0x58   : > { %s121_s12 = sadd.s32 1, %s835_s17  ;;  %s31_s30 = sadd.s32 1, %s843_s19 }
  0x59   : > { %p128_p13 = scmp.ne.s32.totalorder %s835_s17, %s831_s16  ;;  %p32_p1 = scmp.ge.s32.totalorder %s31_s30, 2 }
  0x5a   : > { %p129_p2 = scmp.eq.s32.totalorder %s847_s20, 0  ;;  %p1196_p4 = scmp.ne.s32.totalorder %s1189_s24, 0 }
  0x5b   : > { %p583_p8 = scmp.lt.s32.totalorder %s847_s20, 2  ;;  %s1212_s30 = smov (%p32_p1, %s31_s30), 0 }
  0x5c   : > { %p1026_p6 = por %p1196_p4, %p128_p13  ;;  %p130_p9 = por %p129_p2, %p128_p13 }
  0x5d   : > { %s237_s26 = sand.u32 1, %s835_s17   ;;  %s116_s5 = ssub.s32 %s843_s19, %s1212_s30 }
  0x5e   : > { %p119_p12 = scmp.eq.s32.totalorder %s116_s5, 0  ;;  %s522_s9 = sshll.u32 %s237_s26, 6 }
  0x5f   : > { %s544_s7 = sshll.u32 %s843_s19, 10  ;;  %s241_s13 = scalar_lea.vmem [#allocation8], %s522_s9 }
  0x60   : > { %s1038_s8 = scalar_select %p119_p12, %s835_s17, %s121_s12  }
  0x61   : > { %s1043_s24 = scalar_lea.hbm %s1179_s3, %s544_s7  ;;  %s251_s14 = sshll.u32 %s241_s13, 4  ;;  %s1045_s14 = int_to_ptr.vmem [resolvable:$true] %s251_s14 }
  0x62   : > { %p1049_p11 = pnand %p583_p8, %p130_p9  ;;  %s1053_s6 = scalar_lea.sflag [#allocation9], %s237_s26 }
  0x63   : > { %s727_s29 = scalar_lea.hbm %s1043_s24, 1024  ;;  %s732_s9 = scalar_lea.hbm %s1179_s3, 2048 }
  0x64   : > { %p728_p0 = scmp.ne.s32.totalorder %s1043_s24, %s727_s29  ;;  %p729_p3 = pneg %p1049_p11 }
  0x65   : > { %p733_p10 = scmp.lt.u32.totalorder %s1043_s24, %s1179_s3  ;;  %p734_p13 = scmp.lt.u32.totalorder %s732_s9, %s727_s29 }
  0x66   : > { %p730_p5 = pnand %p729_p3, %p728_p0  ;;  %p736_p2 = scmp.lt.u32.totalorder %s727_s29, %s1043_s24 }
  0x67   : > { %p735_p1 = por %p734_p13, %p733_p10 }
  0x68   : > { %p731_p7 = pneg %p730_p5 }
  0x69   : > { %p737_p4 = por %p736_p2, %p735_p1 }
  0x6b   : > { %p738_p8 = pnand %p737_p4, %p731_p7 }
  0x6d   : > { %741 = shalt.err (!%p738_p8)
}
  0x6e   : > { %s742_s26 = scalar_lea.vmem %s1045_s14, 1024  ;;  %s854_s11 = smov [#allocation8]  }
  0x6f   : > { %p743_p9 = scmp.ne.s32.totalorder %s1045_s14, %s742_s26  ;;  %s747_s13 = sshll.u32 %s854_s11, 4  ;;  %s748_s13 = int_to_ptr.vmem [resolvable:$false] %s747_s13 }
  0x70   : > { %s749_s12 = scalar_lea.vmem %s748_s13, 2048  ;;  %p750_p5 = scmp.lt.s32.totalorder %s1045_s14, %s748_s13 }
  0x71   : > { %p745_p12 = pnand %p743_p9, %p729_p3  ;;  %p751_p10 = scmp.lt.s32.totalorder %s749_s12, %s742_s26 }
  0x73   : > { %p746_p0 = pneg %p745_p12  ;;  %p752_p13 = por %p751_p10, %p750_p5 }
  0x75   : > { %p753_p1 = pnand %p752_p13, %p746_p0 }
  0x77   : > { %756 = shalt.err (!%p753_p1)
}
  0x78   : > { %575 = dma.hbm_to_vmem [thread:$0]  (!%p1049_p11), %s1043_s24, 1024, %s1045_s14, %s1053_s6, %s851_s22, %s851_s22, %s852_s28  }
  0x79   : > { %p1199_p3 = scmp.ne.s32.totalorder %s1193_s27, 0 }
  0x7a   : > { %p1200_p7 = scmp.ne.s32.totalorder (!%p1199_p3), %s1188_s23, 0 }
  0x7b   : > { %263 = sbr.rel (%p1199_p3) target bundleno = 166 (0xa6), region = 36 }
  0x82   : > { %810 = dma.done.wait (%p1200_p7), [#allocation3], 512  }
  0x83   : > { %812 = vsyncadd (%p1200_p7), [#allocation3], 4294966784 }
  0x84   : > { %814 = dma.done.wait (%p1200_p7), [#allocation6], 1024  }
  0x85   : > { %816 = vsyncadd (%p1200_p7), [#allocation6], 4294966272  ;;  %s1095_s21 = sand.u32 1, %s831_s16   ;;  %p1201_p11 = scmp.ne.s32.totalorder %s1190_s25, 0 }
  0x86   : > { %s529_s27 = sshll.u32 %s1095_s21, 6  ;;  %s278_s22 = scalar_lea.sflag [#allocation9], %s1095_s21 }
  0x87   : > { %s1101_s28 = scalar_lea.vmem [#allocation8], %s529_s27 }
  0x88   : > { %818 = dma.done.wait (%p1201_p11), %s278_s22, 1024  }
  0x89   : > { %820 = vsyncadd (%p1201_p11), %s278_s22, 4294966272  ;;  %v311_v0 = vld [vmem:[#allocation2] sm:$0xff]  ;;  %v312_v5 = vld [vmem:[#allocation2 + $0x8] sm:$0xff]  ;;  %vm349_vm0 = vcmask 261120   ;;  %s305_s23 = scalar_lea.vmem [#allocation10], %s529_s27  ;;  %s545_s24 = sshll.u32 %s839_s18, 10 }
  0x8a   : > { %v315_v1 = vld [vmem:[#allocation5] sm:$0xff]  ;;  %v316_v6 = vld [vmem:[#allocation5 + $0x8] sm:$0xff]  ;;  %v313_v11 = vld [vmem:[#allocation2 + $0x10] sm:$0xff]  ;;  %s391_s25 = sshll.u32 %s305_s23, 4  ;;  %s1124_s6 = scalar_lea.hbm %s1180_s4, %s545_s24  ;;  %s1119_s25 = int_to_ptr.vmem [resolvable:$true] %s391_s25 }
  0x8b   : > { %v323_v2 = vld [vmem:[%s1101_s28] sm:$0xff]  ;;  %v324_v9 = vld [vmem:[%s1101_s28 + $0x8] sm:$0xff]  ;;  %v317_v15 = vld [vmem:[#allocation5 + $0x10] sm:$0xff]  ;;  %s375_s29 = scalar_lea.sflag [#allocation4], %s1095_s21  ;;  %s757_s5 = scalar_lea.vmem %s1119_s25, 1024 }
  0x8c   : > { %v531_v3 = vld [vmem:[%s1101_s28 + $0x20] sm:$0xff]  ;;  %v332_v4 = vmul.f32 %v323_v2, %v311_v0  ;;  %v353_v7 = vmul.f32 %v323_v2, %v315_v1  ;;  %v532_v10 = vld [vmem:[%s1101_s28 + $0x28] sm:$0xff]  ;;  %v333_v13 = vmul.f32 %v324_v9, %v312_v5  ;;  %v325_v16 = vld [vmem:[%s1101_s28 + $0x10] sm:$0xff]  ;;  %v354_v24 = vmul.f32 %v324_v9, %v316_v6  ;;  %p758_p2 = scmp.ne.s32.totalorder %s1119_s25, %s757_s5  ;;  %s855_s9 = smov [#allocation10]  }
  0x8d   : > { %v340_v8 = vmul.f32 %v531_v3, %v315_v1  ;;  %v341_v14 = vmul.f32 %v532_v10, %v316_v6  ;;  %v533_v17 = vld [vmem:[%s1101_s28 + $0x30] sm:$0xff]  ;;  %v334_v19 = vmul.f32 %v325_v16, %v313_v11  ;;  %v314_v21 = vld [vmem:[#allocation2 + $0x18] sm:$0xff]  ;;  %v355_v25 = vmul.f32 %v325_v16, %v317_v15  ;;  %v319_v30 = vld [vmem:[#allocation7] sm:$0xff]  ;;  %s761_s7 = sshll.u32 %s855_s9, 4  ;;  %s762_s7 = int_to_ptr.vmem [resolvable:$false] %s761_s7 }
  0x8e   : > { %v336_v12 = vadd.f32 %v332_v4, %v323_v2  ;;  %v357_v18 = vadd.f32 %v531_v3, %v353_v7  ;;  %v342_v20 = vmul.f32 %v533_v17, %v317_v15  ;;  %v318_v22 = vld [vmem:[#allocation5 + $0x18] sm:$0xff]  ;;  %v337_v27 = vadd.f32 %v333_v13, %v324_v9  ;;  %v320_v31 = vld [vmem:[#allocation7 + $0x8] sm:$0xff]  ;;  %v321_v37 = vld [vmem:[#allocation7 + $0x10] sm:$0xff]  ;;  %p759_p4 = pnand %p758_p2, %p1026_p6  ;;  %s763_s10 = scalar_lea.vmem %s762_s7, 2048 }
  0x8f   : > { %v326_v23 = vld [vmem:[%s1101_s28 + $0x18] sm:$0xff]  ;;  %v338_v33 = vadd.f32 %v334_v19, %v325_v16  ;;  %v361_v35 = vmul.f32 %v531_v3, %v319_v30  ;;  %v358_v36 = vadd.f32 %v532_v10, %v354_v24  ;;  %v362_v41 = vmul.f32 %v532_v10, %v320_v31  ;;  %p764_p9 = scmp.lt.s32.totalorder %s1119_s25, %s762_s7  ;;  %p765_p12 = scmp.lt.s32.totalorder %s763_s10, %s757_s5 }
  0x90   : > { %v344_v26 = vadd.f32 %v340_v8, %v336_v12  ;;  %v534_v28 = vld [vmem:[%s1101_s28 + $0x38] sm:$0xff]  ;;  %v335_v29 = vmul.f32 %v326_v23, %v314_v21  ;;  %v356_v32 = vmul.f32 %v326_v23, %v318_v22  ;;  %v345_v39 = vadd.f32 %v341_v14, %v337_v27  ;;  %p760_p8 = pneg %p759_p4 }
  0x91   : > { %v343_v34 = vmul.f32 %v534_v28, %v318_v22  ;;  %v322_v38 = vld [vmem:[#allocation7 + $0x18] sm:$0xff]  ;;  %v359_v42 = vadd.f32 %v533_v17, %v355_v25  ;;  %v346_v43 = vadd.f32 %v342_v20, %v338_v33  ;;  %v365_v44 = vadd.f32 %v361_v35, %v357_v18  ;;  %p766_p0 = por %p765_p12, %p764_p9 }
  0x92   : > { %348 = vst [vmem:[%s305_s23] sm:$0xff] %v344_v26  ;;  %v339_v40 = vadd.f32 %v335_v29, %v326_v23  ;;  %v363_v45 = vmul.f32 %v533_v17, %v321_v37  ;;  %v360_v46 = vadd.f32 %v534_v28, %v356_v32  ;;  %350 = vst.msk [vmem:[%s305_s23 + $0x8] sm:$0xff] %vm349_vm0, %v345_v39 }
  0x93   : > { %v366_v48 = vadd.f32 %v362_v41, %v358_v36  ;;  %v364_v49 = vmul.f32 %v534_v28, %v322_v38  ;;  %351 = vst [vmem:[%s305_s23 + $0x10] sm:$0xff] %v346_v43  ;;  %535 = vst [vmem:[%s305_s23 + $0x20] sm:$0xff] %v365_v44  ;;  %p767_p5 = pnand %p766_p0, %p760_p8 }
  0x94   : > { %v347_v47 = vadd.f32 %v343_v34, %v339_v40  ;;  %v367_v50 = vadd.f32 %v363_v45, %v359_v42 }
  0x95   : > { %536 = vst.msk [vmem:[%s305_s23 + $0x28] sm:$0xff] %vm349_vm0, %v366_v48  ;;  %v368_v51 = vadd.f32 %v364_v49, %v360_v46 }
  0x96   : > { %352 = vst.msk [vmem:[%s305_s23 + $0x18] sm:$0xff] %vm349_vm0, %v347_v47  ;;  %537 = vst [vmem:[%s305_s23 + $0x30] sm:$0xff] %v367_v50 }
  0x97   : > { %538 = vst.msk [vmem:[%s305_s23 + $0x38] sm:$0xff] %vm349_vm0, %v368_v51 }
  0x98   : > { %770 = shalt.err (!%p767_p5)
}
  0x99   : > { %s771_s26 = scalar_lea.hbm %s1124_s6, 1024  ;;  %s775_s12 = scalar_lea.hbm %s1180_s4, 2048 }
  0x9a   : > { %p772_p10 = scmp.ne.s32.totalorder %s1124_s6, %s771_s26  ;;  %p776_p3 = scmp.lt.u32.totalorder %s1124_s6, %s1180_s4 }
  0x9b   : > { %p777_p7 = scmp.lt.u32.totalorder %s775_s12, %s771_s26  ;;  %p779_p2 = scmp.lt.u32.totalorder %s771_s26, %s1124_s6 }
  0x9c   : > { %p773_p13 = pnand %p772_p10, %p1026_p6 }
  0x9d   : > { %p778_p11 = por %p777_p7, %p776_p3 }
  0x9e   : > { %p774_p1 = pneg %p773_p13 }
  0x9f   : > { %p780_p4 = por %p779_p2, %p778_p11 }
  0xa1   : > { %p781_p8 = pnand %p780_p4, %p774_p1 }
  0xa3   : > { %784 = shalt.err (!%p781_p8)
}
  0xa4   : > { %s856_s28 = smov 256   ;;  %s857_s23 = smov 16  }
  0xa5   : > { %560 = dma.vmem_to_hbm [thread:$0]  (%p1026_p6), %s1119_s25, 1024, %s1124_s6, %s375_s29, %s856_s28, %s856_s28, %s857_s23  }
  0xa6 PF: > { %s1202_s24 = sld [smem:[#allocation15_spill]]  ;;  %s1203_s14 = sld [smem:[#allocation16_spill]] }
  0xa7   : > { %p1205_p12 = scmp.ge.s32.totalorder %s847_s20, 2 }
  0xac   : > { %s406_s18 = sand.u32 1, %s1202_s24   ;;  %p1204_p9 = scmp.ne.s32.totalorder %s1203_s14, 0 }
  0xad   : > { %s407_s5 = scalar_lea.sflag [#allocation4], %s406_s18 }
  0xae   : > { %p577_p0 = pnand %p1205_p12, %p1204_p9 }
  0xb0   : > { %822 = dma.done.wait (!%p577_p0), %s407_s5, 1024  }
  0xb1   : > { %824 = vsyncadd (!%p577_p0), %s407_s5, 4294966272  ;;  %s22_s20 = sadd.s32 1, %s847_s20   ;;  %s1206_s15 = smov %s831_s16 }
  0xb2   : > { %p19_p5 = scmp.ge.s32.totalorder %s22_s20, 4   ;;  %s1207_s16 = smov %s835_s17 }
  0xb3   : > { %s1208_s17 = smov %s1038_s8  ;;  %s1209_s18 = smov %s843_s19 }
  0xb4   : > { %s1210_s19 = smov %s1212_s30  ;;  %21 = sbr.rel (!%p19_p5) target bundleno = 8 (0x8), region = 99 }
  0xbb   :  { %412 = vsyncpa [#allocation3], 1 }
  0xbc   :  { %414 = vsyncpa [#allocation3 + $0x1], 1 }
  0xbd   :  { %415 = vsyncpa [#allocation6], 1 }
  0xbe   :  { %416 = vsyncpa [#allocation9], 1 }
  0xbf   :  { %418 = vsyncpa [#allocation9 + $0x1], 1 }
  0xc0   :  { %419 = vsyncpa [#allocation4], 1 }
  0xc1   :  { %421 = vsyncpa [#allocation4 + $0x1], 1 }

</bundles_post_ra>
